<compile_context>
chip_gen: v5e
topology: v5e:2x2
jax: 0.10.0
libtpu: 0.0.40
codegen_flags: <defaults>
</compile_context>

<pallas_src>
import functools
import math

import jax
import jax.numpy as jnp
from jax.experimental import pallas as pl
from jax.experimental.pallas import tpu as pltpu


# ---------------------------------------------------------------------------
# Parameter / buffer setup (glue, plain JAX — deterministic, matches torch init)
# ---------------------------------------------------------------------------
def make_positional_encoding(max_len: int, d_model: int,
                             dtype=jnp.float32) -> jnp.ndarray:
    """Recreates the registered `pe` buffer, shape (max_len, 1, d_model)."""
    position = jnp.arange(max_len, dtype=jnp.float32)[:, None]          # (L, 1)
    div_term = jnp.exp(
        jnp.arange(0, d_model, 2, dtype=jnp.float32) * (-math.log(10000.0) / d_model)
    )                                                                    # (D/2,)
    pe = jnp.zeros((max_len, d_model), dtype=jnp.float32)
    pe = pe.at[:, 0::2].set(jnp.sin(position * div_term))
    pe = pe.at[:, 1::2].set(jnp.cos(position * div_term))
    return pe[:, None, :].astype(dtype)          # (max_len, 1, d_model)


# ---------------------------------------------------------------------------
# Pallas kernels
# ---------------------------------------------------------------------------
def _pe_add_kernel(x_ref, pe_ref, o_ref):
    # x_ref: (ts, B, D); pe_ref: (ts, 1, D) -> stride-0 broadcast over batch.
    o_ref[...] = x_ref[...] + pe_ref[...]


def _pe_add_dropout_kernel(x_ref, pe_ref, bits_ref, o_ref, *,
                           threshold: int, scale: float):
    # Fused positional add + inverted dropout.  `bits_ref` is uint8 random
    # bytes drawn in the wrapper (portable; no TPU-only PRNG primitives).
    # drop <=> bits < threshold (threshold = round(p * 256)): pure integer
    # compare, select + scale done in x.dtype (no f32 promotion).
    y = x_ref[...] + pe_ref[...]                                  # (ts, B, D)
    keep = bits_ref[...] >= jnp.asarray(threshold, dtype=jnp.uint8)
    scale_c = jnp.asarray(scale, dtype=y.dtype)                   # folded const
    o_ref[...] = jnp.where(keep, y * scale_c, jnp.zeros((), dtype=y.dtype))


# ---------------------------------------------------------------------------
# Tiling helpers
# ---------------------------------------------------------------------------
def _sublane_multiple(dtype) -> int:
    # 8 for 32-bit, 16 for bf16/f16, 32 for int8/fp8.
    bits = jnp.dtype(dtype).itemsize * 8
    return max(8, 256 // max(bits, 1))


def _vmem_budget() -> tuple[int, int]:
    """(vmem_limit_bytes, target_x_tile_bytes), per TPU generation."""
    try:
        info = pltpu.get_tpu_info()
        vmem = getattr(info, "vmem_capacity_bytes", None)
        if vmem is not None and vmem >= 100 * 1024 * 1024:
            # v5e / v6e: 128 MiB VMEM -> bigger tiles amortize per-step cost.
            return 64 * 1024 * 1024, 8 * 1024 * 1024
    except Exception:
        pass
    # v7x (64 MiB physical per TC) or unknown / interpret: stay conservative.
    return 32 * 1024 * 1024, 4 * 1024 * 1024


def _choose_tile_s(S: int, B: int, D: int, itemsize: int, sublane: int,
                   target_tile_bytes: int) -> int:
    """Largest seq-tile (multiple of `sublane`) whose x-slab fits the target,
    capped so the grid has >=2 steps whenever S allows (v7x 2-TC sharding)."""
    row_bytes = max(1, B * D * itemsize)
    ts = max(sublane, (int(target_tile_bytes // row_bytes) // sublane) * sublane)
    if ts >= S:
        if S > sublane:
            ts = max(sublane, (((S + 1) // 2) // sublane) * sublane)
        else:
            ts = S
    return ts


# ---------------------------------------------------------------------------
# Wrapper
# ---------------------------------------------------------------------------
def positional_encoding_forward(x, pe, *, p: float = 0.1, training: bool = False,
                                rng_key=None, tile_s: int | None = None,
                                donate_x: bool = False):
    """x: (S, B, D); pe: (max_len, 1, D) or (max_len, D).
    Returns dropout(x + pe[:S]).  Set donate_x=True only when the caller
    jit-donates x (otherwise aliasing forces a hidden defensive copy)."""
    S, B, D = x.shape
    pe_slice = pe[:S]
    if pe_slice.ndim == 2:
        pe_slice = pe_slice[:, None, :]
    if pe_slice.dtype != x.dtype:                # no-op if pe was built in x.dtype
        pe_slice = pe_slice.astype(x.dtype)

    do_dropout = bool(training) and p > 0.0
    if do_dropout and p >= 1.0:
        raise ValueError("dropout p must be < 1.0 (scale 1/(1-p) would be inf)")

    sublane = _sublane_multiple(x.dtype)
    vmem_limit, target_tile = _vmem_budget()
    if do_dropout:
        target_tile //= 2                        # headroom for elementwise temps

    if tile_s is None:
        tile_s = _choose_tile_s(S, B, D, x.dtype.itemsize, sublane, target_tile)
    tile_s = min(int(tile_s), S)
    if tile_s < S:
        tile_s = max(sublane, (tile_s // sublane) * sublane)
    grid = (pl.cdiv(S, tile_s),)

    # NOTE: B < 8 leaves sublanes half-empty in-kernel; acceptable here since
    # both paths are HBM-bound (the dropout path's in-kernel work is just a
    # compare + select + mul).
    x_spec = pl.BlockSpec((tile_s, B, D), lambda i: (i, 0, 0))
    pe_spec = pl.BlockSpec((tile_s, 1, D), lambda i: (i, 0, 0))
    out_spec = pl.BlockSpec((tile_s, B, D), lambda i: (i, 0, 0))
    out_shape = jax.ShapeDtypeStruct((S, B, D), x.dtype)
    compiler_params = pltpu.CompilerParams(
        dimension_semantics=("parallel",),       # shards the grid over v7x's 2 TCs
        vmem_limit_bytes=vmem_limit,
    )

    if not do_dropout:
        # Eval mode: dropout is identity; just the broadcast add.
        return pl.pallas_call(
            _pe_add_kernel,
            out_shape=out_shape,
            grid=grid,
            in_specs=[x_spec, pe_spec],
            out_specs=out_spec,
            input_output_aliases=({0: 0} if donate_x else {}),
            compiler_params=compiler_params,
        )(x, pe_slice)

    # Training mode: add + dropout fused in one kernel.  Random bytes are drawn
    # host-side (1 B/element extra HBM read) so the kernel stays portable.
    # TODO(synk): dropout mask cannot match torch.nn.Dropout's RNG stream
    #             bit-for-bit; only the distribution/semantics are preserved.
    if rng_key is None:
        rng_key = jax.random.PRNGKey(0)
    bits = jax.random.bits(rng_key, (S, B, D), dtype=jnp.uint8)
    threshold = min(max(int(round(float(p) * 256.0)), 0), 255)   # drop if bits < thr
    scale = 1.0 / (1.0 - float(p))                               # torch semantics
    bits_spec = pl.BlockSpec((tile_s, B, D), lambda i: (i, 0, 0))

    return pl.pallas_call(
        functools.partial(_pe_add_dropout_kernel, threshold=threshold, scale=scale),
        out_shape=out_shape,
        grid=grid,
        in_specs=[x_spec, pe_spec, bits_spec],
        out_specs=out_spec,
        input_output_aliases=({0: 0} if donate_x else {}),
        compiler_params=compiler_params,
    )(x, pe_slice, bits)


# ---------------------------------------------------------------------------
# Main
# ---------------------------------------------------------------------------
if __name__ == "__main__":
    # Small shapes consistent with the module; D=128 keeps stores lane-dense.
    S, B, D = 16, 4, 128
    MAX_LEN = 64  # stands in for max_len=5000 at small scale

    key = jax.random.PRNGKey(0)
    kx, kdrop = jax.random.split(key)
    x = jax.random.normal(kx, (S, B, D), dtype=jnp.float32)
    pe = make_positional_encoding(MAX_LEN, D, dtype=x.dtype)   # (MAX_LEN, 1, D)

    ref = x + pe[:S]                                           # broadcast over B

    # Eval mode (dropout = identity). tile_s=8 exercises a 2-step pipelined grid.
    out = positional_encoding_forward(x, pe, training=False, tile_s=8)
    out = jax.block_until_ready(out)
    assert out.shape == (S, B, D)
    assert jnp.allclose(out, ref, atol=1e-6), "eval-mode mismatch vs reference"

    # Training mode (fused add + dropout). RNG stream differs from torch, so
    # check the structural property: every element is 0 or (x + pe) / (1 - p).
    p_drop = 0.5
    out_tr = positional_encoding_forward(x, pe, p=p_drop, training=True,
                                         rng_key=kdrop, tile_s=8)
    out_tr = jax.block_until_ready(out_tr)
    scaled = ref / (1.0 - p_drop)
    ok = jnp.isclose(out_tr, 0.0, atol=1e-6) | jnp.isclose(out_tr, scaled, atol=1e-5)
    assert bool(jnp.all(ok)), "training-mode dropout structure mismatch"

    print("KERNEL_OK")
</pallas_src>

<mosaic_0001>
module attributes {stable_mosaic.version = 11 : i64} {
  func.func @_pe_add_kernel(%arg0: i32, %arg1: memref<8x4x128xf32, #tpu.memory_space<vmem>>, %arg2: memref<8x1x128xf32, #tpu.memory_space<vmem>>, %arg3: memref<8x4x128xf32, #tpu.memory_space<vmem>>) attributes {dimension_semantics = [#tpu.dimension_semantics<parallel>], iteration_bounds = array<i64: 2>, scalar_prefetch = 0 : i64, scratch_operands = 0 : i64, tpu.core_type = #tpu.core_type<tc>, window_params = [{transform_indices = @transform_0, window_bounds = array<i64: 8, 4, 128>}, {transform_indices = @transform_1, window_bounds = array<i64: 8, 1, 128>}, {transform_indices = @transform_2, window_bounds = array<i64: 8, 4, 128>}]} {
    %c0 = arith.constant 0 : index
    %c0_0 = arith.constant 0 : index
    %c0_1 = arith.constant 0 : index
    %0 = vector.load %arg1[%c0, %c0_0, %c0_1] : memref<8x4x128xf32, #tpu.memory_space<vmem>>, vector<8x4x128xf32>
    %c0_2 = arith.constant 0 : index
    %c0_3 = arith.constant 0 : index
    %c0_4 = arith.constant 0 : index
    %1 = vector.load %arg2[%c0_2, %c0_3, %c0_4] : memref<8x1x128xf32, #tpu.memory_space<vmem>>, vector<8x1x128xf32>
    %2 = vector.broadcast %1 : vector<8x1x128xf32> to vector<8x4x128xf32>
    %3 = arith.addf %0, %2 : vector<8x4x128xf32>
    %c0_5 = arith.constant 0 : index
    %c0_6 = arith.constant 0 : index
    %c0_7 = arith.constant 0 : index
    %4 = vector.load %arg3[%c0_5, %c0_6, %c0_7] : memref<8x4x128xf32, #tpu.memory_space<vmem>>, vector<8x4x128xf32>
    tpu.vector_store %arg3[%c0_5, %c0_6, %c0_7], %3 {strides = array<i32>} : memref<8x4x128xf32, #tpu.memory_space<vmem>>, vector<8x4x128xf32>,
    return
  }
  func.func @transform_0(%arg0: i32) -> (i32, i32, i32) {
    %c0_i32 = arith.constant 0 : i32
    %c0_i32_0 = arith.constant 0 : i32
    %c0_i32_1 = arith.constant 0 : i32
    return %arg0, %c0_i32, %c0_i32_0 : i32, i32, i32
  }
  func.func @transform_1(%arg0: i32) -> (i32, i32, i32) {
    %c0_i32 = arith.constant 0 : i32
    %c0_i32_0 = arith.constant 0 : i32
    %c0_i32_1 = arith.constant 0 : i32
    return %arg0, %c0_i32, %c0_i32_0 : i32, i32, i32
  }
  func.func @transform_2(%arg0: i32) -> (i32, i32, i32) {
    %c0_i32 = arith.constant 0 : i32
    %c0_i32_0 = arith.constant 0 : i32
    %c0_i32_1 = arith.constant 0 : i32
    return %arg0, %c0_i32, %c0_i32_0 : i32, i32, i32
  }
}

</mosaic_0001>

<bundles_post_ra>
// kernel: tpu_custom_call.1
= control target key start
LH: loop header
LB: loop body
LE: loop exit
PB: predicated region body
PF: predicated region fallthrough
CT: control target
= control target key end

     0   :  { %7 = vsyncpa [#allocation3], 0  ;;  %s812_s0 = inlined_call_operand.hbm [shape: f32[16,4,128], index: 0, kind: input, shape index: {}]   ;;  %s813_s1 = inlined_call_operand.hbm [shape: f32[16,1,128], index: 1, kind: input, shape index: {}]   ;;  %s814_s2 = inlined_call_operand.hbm [shape: f32[16,4,128], index: 2, kind: output, shape index: {}]  }
   0x1   :  { %9 = vsyncpa [#allocation3 + $0x1], 0 }
   0x2   :  { %10 = vsyncpa [#allocation6], 0 }
   0x3   :  { %12 = vsyncpa [#allocation6 + $0x1], 0 }
   0x4   :  { %13 = vsyncpa [#allocation4], 0 }
   0x5   :  { %15 = vsyncpa [#allocation4 + $0x1], 0  ;;  %s613_s9 = smov 0   ;;  %s615_s10 = smov 0  }
   0x6   :  { %s617_s11 = smov 0   ;;  %s619_s12 = smov 0  }
   0x7 LB: > { %s634_s13 = sadd.s32 4294967295, %s590_s12   ;;  %s376_s14 = sadd.s32 4294967294, %s590_s12   ;;  %s590_s12 = sphi %s619_s12, %s825_s12   ;;  %s586_s11 = sphi %s617_s11, %s824_s11   ;;  %s582_s10 = sphi %s615_s10, %s823_s10   ;;  %s578_s9 = sphi %s613_s9, %s822_s9  }
   0x8   : > { %s638_s15 = sadd.s32 1, %s590_s12   ;;  %s28_s16 = sadd.s32 1, %s586_s11 }
   0x9   : > { %s25_s17 = ssub.s32 %s590_s12, %s638_s15  ;;  %p35_p0 = scmp.ne.s32.totalorder %s586_s11, %s582_s10 }
   0xa   : > { %p26_p1 = scmp.eq.s32.totalorder %s25_s17, 0  ;;  %p36_p2 = scmp.eq.s32.totalorder %s590_s12, 0 }
   0xb   : > { %p41_p3 = scmp.ne.s32.totalorder %s582_s10, %s578_s9  ;;  %p42_p4 = scmp.eq.s32.totalorder %s634_s13, 0 }
   0xc   : > { %s650_s18 = scalar_select %p26_p1, %s586_s11, %s28_s16  }
   0xd   : > { %p652_p5 = por %p36_p2, %p35_p0  ;;  %p656_p6 = por %p42_p4, %p41_p3 }
   0xe   : > { %p91_p7 = scmp.eq.s32.totalorder %s634_s13, 1  ;;  %p97_p8 = scmp.eq.s32.totalorder %s376_s14, 1 }
   0xf   : > { %p412_p10 = scmp.lt.s32.totalorder %s590_s12, 2  ;;  %s672_s23 = sand.u32 1, %s586_s11  }
  0x10   : > { %p663_p11 = por %p91_p7, %p35_p0  ;;  %p667_p12 = por %p97_p8, %p41_p3 }
  0x11   : > { %s393_s24 = sshll.u32 %s590_s12, 5  ;;  %s379_s25 = sshll.u32 %s672_s23, 5 }
  0x12   : > { %s126_s28 = scalar_lea.hbm %s812_s0, %s393_s24  ;;  %s121_s30 = scalar_lea.vmem [#allocation2], %s379_s25 }
  0x13   : > { %s127_s29 = sshll.u32 %s126_s28, 4  ;;  %s129_s3 = sshll.u32 %s121_s30, 4  ;;  %s128_s29 = int_to_ptr.hbm [resolvable:$true] %s127_s29  ;;  %s130_s3 = int_to_ptr.vmem [resolvable:$true] %s129_s3 }
  0x14   : > { %p681_p13 = pnand %p412_p10, %p652_p5  ;;  %p384_p0 = scmp.ge.s32.totalorder %s590_s12, 1 }
  0x15   : > { %p158_p1 = scmp.lt.s32.totalorder %s590_s12, 3  ;;  %s118_s5 = scalar_lea.sflag [#allocation3], %s672_s23 }
  0x16   : > { %s460_s6 = sshra.s32 %s128_s29, 4  ;;  %p464_p3 = pneg %p681_p13  ;;  %s461_s6 = int_to_ptr.hbm [resolvable:$true] %s460_s6 }
  0x17   : > { %s462_s7 = scalar_lea.hbm %s461_s6, 32  ;;  %s467_s16 = scalar_lea.hbm %s812_s0, 64 }
  0x18   : > { %p463_p2 = scmp.ne.s32.totalorder %s461_s6, %s462_s7  ;;  %p468_p5 = scmp.lt.s32.totalorder %s461_s6, %s812_s0 }
  0x19   : > { %p469_p8 = scmp.lt.s32.totalorder %s467_s16, %s462_s7 }
  0x1a   : > { %p465_p4 = pnand %p464_p3, %p463_p2 }
  0x1b   : > { %p470_p10 = por %p469_p8, %p468_p5 }
  0x1c   : > { %p466_p7 = pneg %p465_p4 }
  0x1e   : > { %p471_p9 = pnand %p470_p10, %p466_p7 }
  0x20   : > { %474 = shalt.err (!%p471_p9)
}
  0x21   : > { %s592_s24 = smov 64   ;;  %s593_s25 = smov 4  }
  0x22   : > { %404 = dma.hbm_to_vmem [thread:$0]  (!%p681_p13), %s128_s29, 512, %s130_s3, %s118_s5, %s592_s24, %s592_s24, %s593_s25  }
  0x23   : > { %p705_p2 = pnand %p384_p0, %p158_p1  ;;  %s382_s27 = sshll.u32 %s672_s23, 3 }
  0x24   : > { %s383_s28 = sshll.u32 %s590_s12, 3  ;;  %s143_s14 = scalar_lea.vmem [#allocation5], %s382_s27 }
  0x25   : > { %s147_s7 = scalar_lea.hbm %s813_s1, %s383_s28  ;;  %s150_s16 = sshll.u32 %s143_s14, 4  ;;  %s151_s16 = int_to_ptr.vmem [resolvable:$true] %s150_s16 }
  0x26   : > { %s148_s8 = sshll.u32 %s147_s7, 4  ;;  %s140_s17 = scalar_lea.sflag [#allocation6], %s672_s23  ;;  %s149_s8 = int_to_ptr.hbm [resolvable:$true] %s148_s8 }
  0x27   : > { %s490_s19 = sshra.s32 %s149_s8, 4  ;;  %s497_s24 = scalar_lea.hbm %s813_s1, 16  ;;  %s491_s19 = int_to_ptr.hbm [resolvable:$true] %s490_s19 }
  0x28   : > { %s492_s29 = scalar_lea.hbm %s491_s19, 8  ;;  %p498_p4 = scmp.lt.s32.totalorder %s491_s19, %s813_s1 }
  0x29   : > { %p493_p9 = scmp.ne.s32.totalorder %s491_s19, %s492_s29  ;;  %p499_p7 = scmp.lt.s32.totalorder %s497_s24, %s492_s29 }
  0x2b   : > { %p495_p0 = pnand %p493_p9, %p464_p3  ;;  %p500_p5 = por %p499_p7, %p498_p4 }
  0x2d   : > { %p496_p1 = pneg %p495_p0 }
  0x2f   : > { %p501_p8 = pnand %p500_p5, %p496_p1 }
  0x31   : > { %504 = shalt.err (!%p501_p8)
}
  0x32   : > { %s594_s23 = smov 16   ;;  %s595_s27 = smov 1  }
  0x33   : > { %407 = dma.hbm_to_vmem [thread:$0]  (!%p681_p13), %s149_s8, 128, %s151_s16, %s140_s17, %s594_s23, %s594_s23, %s595_s27  }
  0x34   : > { %162 = sbr.rel (%p705_p2) target bundleno = 81 (0x51), region = 28  ;;  %s729_s30 = sand.u32 (!%p705_p2), 1, %s582_s10  }
  0x35   : > { %s385_s6 = sshll.u32 (!%p705_p2), %s729_s30, 5  ;;  %s165_s7 = scalar_lea.sflag (!%p705_p2), [#allocation3], %s729_s30 }
  0x36   : > { %s733_s14 = scalar_lea.vmem (!%p705_p2), [#allocation2], %s385_s6 }
  0x39   : > { %565 = dma.done.wait (%p656_p6), %s165_s7, 512  }
  0x3a   : > { %567 = vsyncadd (%p656_p6), %s165_s7, 4294966784  ;;  %s386_s4 = sshll.u32 %s729_s30, 3  ;;  %s175_s26 = scalar_lea.sflag [#allocation6], %s729_s30 }
  0x3b   : > { %s741_s8 = scalar_lea.vmem [#allocation5], %s386_s4 }
  0x3c   : > { %569 = dma.done.wait (%p656_p6), %s175_s26, 128  }
  0x3d   : > { %571 = vsyncadd (%p656_p6), %s175_s26, 4294967168  ;;  %s394_s16 = sshll.u32 %s634_s13, 5  ;;  %s748_s17 = scalar_lea.vmem [#allocation7], %s385_s6  ;;  %v208_v0 = vld [vmem:[%s733_s14] sm:$0xf] }
  0x3e   : > { %s277_s19 = sshll.u32 %s748_s17, 4  ;;  %v452_v1 = vld [vmem:[%s741_s8] ss:$0 sm:$0xff]  ;;  %v209_v2 = vld [vmem:[%s733_s14 + $0x4] sm:$0xf]  ;;  %s758_s3 = scalar_lea.hbm %s814_s2, %s394_s16  ;;  %s278_s19 = int_to_ptr.vmem [resolvable:$true] %s277_s19 }
  0x3f   : > { %v453_v3 = vld [vmem:[%s741_s8 + $0x1] ss:$0 sm:$0xff]  ;;  %v248_v4 = vadd.f32 %v452_v1, %v208_v0  ;;  %v454_v6 = vld [vmem:[%s741_s8 + $0x2] ss:$0 sm:$0xff]  ;;  %v211_v8 = vld [vmem:[%s733_s14 + $0xc] sm:$0xf] }
  0x40   : > { %v210_v5 = vld [vmem:[%s733_s14 + $0x8] sm:$0xf]  ;;  %v249_v7 = vadd.f32 %v453_v3, %v209_v2  ;;  %v212_v11 = vld [vmem:[%s733_s14 + $0x10] sm:$0xf]  ;;  %s279_s13 = sshll.u32 %s758_s3, 4  ;;  %s265_s5 = scalar_lea.sflag [#allocation4], %s729_s30  ;;  %s280_s13 = int_to_ptr.hbm [resolvable:$true] %s279_s13 }
  0x41   : > { %v455_v9 = vld [vmem:[%s741_s8 + $0x3] ss:$0 sm:$0xff]  ;;  %256 = vst [vmem:[%s748_s17] sm:$0xf] %v248_v4  ;;  %v250_v10 = vadd.f32 %v454_v6, %v210_v5  ;;  %v456_v13 = vld [vmem:[%s741_s8 + $0x4] ss:$0 sm:$0xff]  ;;  %s534_s24 = sshra.s32 %s280_s13, 4  ;;  %s535_s24 = int_to_ptr.hbm [resolvable:$true] %s534_s24 }
  0x42   : > { %257 = vst [vmem:[%s748_s17 + $0x4] sm:$0xf] %v249_v7  ;;  %v251_v12 = vadd.f32 %v455_v9, %v211_v8  ;;  %v213_v14 = vld [vmem:[%s733_s14 + $0x14] sm:$0xf]  ;;  %v457_v15 = vld [vmem:[%s741_s8 + $0x5] ss:$0 sm:$0xff]  ;;  %v252_v16 = vadd.f32 %v456_v13, %v212_v11  ;;  %p541_p10 = scmp.lt.s32.totalorder %s535_s24, %s814_s2 }
  0x43   : > { %258 = vst [vmem:[%s748_s17 + $0x8] sm:$0xf] %v250_v10  ;;  %v214_v17 = vld [vmem:[%s733_s14 + $0x18] sm:$0xf]  ;;  %v253_v18 = vadd.f32 %v457_v15, %v213_v14  ;;  %v458_v19 = vld [vmem:[%s741_s8 + $0x6] ss:$0 sm:$0xff] }
  0x44   : > { %259 = vst [vmem:[%s748_s17 + $0xc] sm:$0xf] %v251_v12  ;;  %v215_v20 = vld [vmem:[%s733_s14 + $0x1c] sm:$0xf]  ;;  %v459_v21 = vld [vmem:[%s741_s8 + $0x7] ss:$0 sm:$0xff]  ;;  %v254_v22 = vadd.f32 %v458_v19, %v214_v17 }
  0x45   : > { %260 = vst [vmem:[%s748_s17 + $0x10] sm:$0xf] %v252_v16  ;;  %v255_v23 = vadd.f32 %v459_v21, %v215_v20  ;;  %s536_s25 = scalar_lea.hbm %s535_s24, 32  ;;  %s540_s27 = scalar_lea.hbm %s814_s2, 64 }
  0x46   : > { %261 = vst [vmem:[%s748_s17 + $0x14] sm:$0xf] %v253_v18  ;;  %p537_p6 = scmp.ne.s32.totalorder %s535_s24, %s536_s25  ;;  %p542_p2 = scmp.lt.s32.totalorder %s540_s27, %s536_s25 }
  0x47   : > { %262 = vst [vmem:[%s748_s17 + $0x18] sm:$0xf] %v254_v22 }
  0x48   : > { %263 = vst [vmem:[%s748_s17 + $0x1c] sm:$0xf] %v255_v23  ;;  %p538_p13 = pnand %p537_p6, %p663_p11  ;;  %p543_p9 = por %p542_p2, %p541_p10 }
  0x4a   : > { %p539_p3 = pneg %p538_p13 }
  0x4c   : > { %p544_p0 = pnand %p543_p9, %p539_p3 }
  0x4e   : > { %547 = shalt.err (!%p544_p0)
}
  0x4f   : > { %s596_s30 = smov 64   ;;  %s597_s14 = smov 4  }
  0x50   : > { %399 = dma.vmem_to_hbm [thread:$0]  (%p663_p11), %s278_s19, 512, %s280_s13, %s265_s5, %s596_s30, %s596_s30, %s597_s14  }
  0x51 PF: > { %s294_s4 = sand.u32 1, %s578_s9   ;;  %p821_p1 = scmp.ge.s32.totalorder %s590_s12, 2 }
  0x52   : > { %s295_s26 = scalar_lea.sflag [#allocation4], %s294_s4 }
  0x53   : > { %p409_p4 = pnand %p821_p1, %p667_p12 }
  0x55   : > { %p410_p7 = pneg %p409_p4 }
  0x57   : > { %573 = dma.done.wait (%p410_p7), %s295_s26, 512  }
  0x58   : > { %575 = vsyncadd (%p410_p7), %s295_s26, 4294966784  ;;  %p18_p5 = scmp.ge.s32.totalorder %s638_s15, 4   ;;  %s822_s9 = smov %s582_s10 }
  0x59   : > { %s823_s10 = smov %s586_s11  ;;  %s824_s11 = smov %s650_s18 }
  0x5a   : > { %s825_s12 = smov %s638_s15  ;;  %20 = sbr.rel (!%p18_p5) target bundleno = 7 (0x7), region = 86 }
  0x5f   :  { %301 = vsyncpa [#allocation3], 1 }
  0x60   :  { %303 = vsyncpa [#allocation3 + $0x1], 1 }
  0x61   :  { %304 = vsyncpa [#allocation6], 1 }
  0x62   :  { %306 = vsyncpa [#allocation6 + $0x1], 1 }
  0x63   :  { %307 = vsyncpa [#allocation4], 1 }
  0x64   :  { %309 = vsyncpa [#allocation4 + $0x1], 1 }

</bundles_post_ra>
